<compile_context>
chip_gen: v7x
topology: tpu7x:2x2x1
jax: 0.10.0
libtpu: 0.0.40
codegen_flags: <defaults>
</compile_context>

<pallas_src>
import math

import jax
import jax.numpy as jnp
from jax import lax
from jax.experimental import pallas as pl
from jax.experimental.pallas import tpu as pltpu


_LANE_CHOICES = (512, 256, 128)   # lane-dense widths (multiples of 128)


def _round_up(x: int, m: int) -> int:
    return ((x + m - 1) // m) * m


def _hw_plan():
    """(max tile rows, vmem_limit_bytes or None), tuned per TPU generation."""
    kind = ""
    try:
        kind = jax.devices()[0].device_kind.lower()
    except Exception:
        pass
    if "v6" in kind:                       # v6e: 128 MiB VMEM, raise scoped limit
        return 2048, 48 << 20              # 4 MiB f32 tiles, <=24 MiB double-buffered
    if "v7" in kind or "7x" in kind:       # v7x: only 64 MiB VMEM per TensorCore
        return 1024, 40 << 20              # 2 MiB tiles, <=40 MiB scoped
    # v5e / v5p / unknown: stay inside the 16 MiB scoped-VMEM default.
    return 512, None


def _lane_layout(total: int):
    """Pick lane width L, row count, and flat zero-pad (0 in the common case)."""
    for lane in _LANE_CHOICES:
        if total % lane == 0:
            return lane, total // lane, 0
    lane = 128                              # rare fallback: total % 128 != 0
    padded = _round_up(total, lane)
    return lane, padded // lane, padded - total


def _pick_tm(rows: int, tm_max: int) -> int:
    # Either the full row extent (always a legal block) or tm_max (multiple of
    # 16, so the (8,128) rule and bf16/int8 sublane packing are satisfied).
    return rows if rows <= tm_max else tm_max


# ----------------------------- kernels -------------------------------------

def _sq_diff_kernel(a_ref, b_ref, o_ref):
    # elementwise (a - b)^2 in f32 on a lane-dense VMEM tile; cast at the store.
    d = a_ref[...].astype(jnp.float32) - b_ref[...].astype(jnp.float32)
    o_ref[...] = (d * d).astype(o_ref.dtype)


def _make_partial_sum_kernel(tm: int, rows: int):
    """Per-tile partial sum of squared differences, reduced to an (8, L) slab.

    Invalid rows of the (masked) boundary block are zeroed in-kernel, so the
    wrapper never needs an explicit zero-pad pass.  Each grid step writes its
    own output block -> the grid axis is fully parallel (megacore friendly).
    """
    def kernel(a_ref, b_ref, o_ref):
        i = pl.program_id(0)
        d = a_ref[...].astype(jnp.float32) - b_ref[...].astype(jnp.float32)
        sq = d * d
        lanes = sq.shape[-1]
        row = lax.broadcasted_iota(jnp.int32, sq.shape, 0)
        sq = jnp.where(row < (rows - i * tm), sq, 0.0)   # mask garbage rows
        if tm % 8 == 0:
            # pure VPU adds across vreg rows; no cross-lane XLU reduce here
            acc = jnp.sum(sq.reshape(tm // 8, 8, lanes), axis=0)
        else:
            # tiny single-tile case (tm == rows < 8k): put the sum in row 0
            s = jnp.sum(sq, axis=0, keepdims=True)                  # (1, L)
            rowi = lax.broadcasted_iota(jnp.int32, (8, lanes), 0)
            acc = jnp.where(rowi == 0, jnp.broadcast_to(s, (8, lanes)), 0.0)
        o_ref[0] = acc
    return kernel


def _distance_kernel(data_ref, o_ref, last_sc):
    """(last_task - data[task])^2 with the last-task tile cached in VMEM scratch.

    The task grid axis is reordered so step t==0 visits the last task: it
    stashes that tile into `last_sc` and writes the (exactly zero) last-task
    output slot; steps t>0 read each remaining task exactly once from HBM.
    """
    t = pl.program_id(1)
    x = data_ref[0].astype(jnp.float32)

    @pl.when(t == 0)
    def _():
        last_sc[...] = x
        o_ref[0] = jnp.zeros(o_ref.shape[1:], o_ref.dtype)

    @pl.when(t != 0)
    def _():
        d = last_sc[...] - x
        o_ref[0] = (d * d).astype(o_ref.dtype)


# ----------------------------- wrappers ------------------------------------

def simscore_l2(batch1, batch2, reduction: bool = False):
    """Pallas implementation of SimScore_L2.forward."""
    assert batch1.shape == batch2.shape, "inputs must have identical shapes"
    orig_shape = batch1.shape
    out_dtype = jnp.result_type(batch1.dtype, batch2.dtype)
    total = math.prod(orig_shape) if orig_shape else 1

    tm_max, vmem_limit = _hw_plan()
    lane, rows, pad = _lane_layout(total)
    tm = _pick_tm(rows, tm_max)
    n_tiles = pl.cdiv(rows, tm)

    def to2d(x):
        flat = jnp.ravel(x)
        if pad:  # slow path only when total % 128 != 0
            flat = jnp.pad(flat, (0, pad))
        return flat.reshape(rows, lane)

    a2, b2 = to2d(batch1), to2d(batch2)
    tile_spec = pl.BlockSpec((tm, lane), lambda i: (i, 0))

    if reduction:
        partials = pl.pallas_call(
            _make_partial_sum_kernel(tm, rows),
            out_shape=jax.ShapeDtypeStruct((n_tiles, 8, lane), jnp.float32),
            grid=(n_tiles,),
            in_specs=[tile_spec, tile_spec],
            out_specs=pl.BlockSpec((1, 8, lane), lambda i: (i, 0, 0)),
            compiler_params=pltpu.CompilerParams(
                dimension_semantics=("parallel",),
                vmem_limit_bytes=vmem_limit),
        )(a2, b2)
        # tiny cross-lane/tile reduce done once, outside the streaming loop
        return (jnp.sum(partials) / total).astype(out_dtype)

    out2 = pl.pallas_call(
        _sq_diff_kernel,
        out_shape=jax.ShapeDtypeStruct((rows, lane), out_dtype),
        grid=(n_tiles,),
        in_specs=[tile_spec, tile_spec],
        out_specs=tile_spec,
        compiler_params=pltpu.CompilerParams(
            dimension_semantics=("parallel",),
            vmem_limit_bytes=vmem_limit),
    )(a2, b2)

    if pad:
        return out2.reshape(rows * lane)[:total].reshape(orig_shape)
    return out2.reshape(orig_shape)          # metadata-only reshape, no copy


def compute_distances_task_major(data_tm):
    """Fused distance maps for task-major data (n_tasks, ...).

    Returns (n_tasks, ...) with out[t] = (data[-1] - data[t])**2 and the last
    task slot exactly zero.  No layout transposes, no pad/slice passes when the
    per-task element count is a multiple of 128; each element is read from HBM
    exactly once.
    """
    n_tasks = data_tm.shape[0]
    inner_shape = data_tm.shape[1:]
    out_dtype = data_tm.dtype
    total = math.prod(inner_shape)

    tm_max, vmem_limit = _hw_plan()
    lane, rows, pad = _lane_layout(total)
    tm = _pick_tm(rows, tm_max)
    n_tiles = pl.cdiv(rows, tm)

    flat = data_tm.reshape(n_tasks, total)
    if pad:  # slow path only when total % 128 != 0
        flat = jnp.pad(flat, ((0, 0), (0, pad)))
    d3 = flat.reshape(n_tasks, rows, lane)

    last = n_tasks - 1
    # Task order: grid t=0 -> last task (cached into scratch), t=k -> task k-1.
    task_map = lambda i, t: ((t + last) % n_tasks, i, 0)

    out = pl.pallas_call(
        _distance_kernel,
        out_shape=jax.ShapeDtypeStruct((n_tasks, rows, lane), out_dtype),
        grid=(n_tiles, n_tasks),   # task axis innermost: scratch stays valid
        in_specs=[pl.BlockSpec((1, tm, lane), task_map)],
        out_specs=pl.BlockSpec((1, tm, lane), task_map),
        scratch_shapes=[pltpu.VMEM((tm, lane), jnp.float32)],
        compiler_params=pltpu.CompilerParams(
            dimension_semantics=("parallel", "arbitrary"),
            vmem_limit_bytes=vmem_limit),
    )(d3)

    if pad:
        return out.reshape(n_tasks, rows * lane)[:, :total].reshape(
            (n_tasks,) + inner_shape)
    return out.reshape((n_tasks,) + inner_shape)


def compute_distances(data):
    """ScoreFunctions.compute_distances with the L2 score (PyTorch layout).

    data: (bs, n_chs, h, w, n_tasks) -> (bs, n_chs, h, w, n_tasks).
    Exactly one transpose on the way in and one on the way out (layout only);
    prefer compute_distances_task_major if the caller can hold task-major data.
    """
    data_tm = jnp.moveaxis(data, -1, 0)
    out_tm = compute_distances_task_major(data_tm)
    return jnp.moveaxis(out_tm, 0, -1)


if __name__ == "__main__":
    key = jax.random.PRNGKey(0)
    k1, k2, k3 = jax.random.split(key, 3)

    B, C, H, W = 2, 4, 16, 16  # NCHW, small synthetic shapes
    batch1 = jax.random.normal(k1, (B, C, H, W), dtype=jnp.float32)
    batch2 = jax.random.normal(k2, (B, C, H, W), dtype=jnp.float32)

    # reduction=False (module default): elementwise squared error
    out = jax.block_until_ready(simscore_l2(batch1, batch2))
    ref = (batch1 - batch2) ** 2
    assert out.shape == (B, C, H, W)
    assert jnp.allclose(out, ref, atol=1e-6), "elementwise mismatch vs reference"

    # reduction=True: fully-parallel in-kernel partial sums + tiny wrapper reduce
    mse = jax.block_until_ready(simscore_l2(batch1, batch2, reduction=True))
    assert jnp.allclose(mse, jnp.mean(ref), atol=1e-6, rtol=1e-6), "mean mismatch"

    # fused compute_distances path
    n_tasks = 3
    data = jax.random.normal(k3, (B, C, H, W, n_tasks), dtype=jnp.float32)
    dmaps = jax.block_until_ready(compute_distances(data))
    last = data[..., -1]
    ref_maps = [(last - data[..., i]) ** 2 for i in range(n_tasks - 1)]
    ref_maps.append(jnp.zeros_like(last))
    ref_d = jnp.stack(ref_maps, axis=-1)
    assert dmaps.shape == (B, C, H, W, n_tasks)
    assert jnp.allclose(dmaps, ref_d, atol=1e-6), "compute_distances mismatch"

    print("KERNEL_OK")
</pallas_src>

<mosaic_0001>
module attributes {stable_mosaic.version = 11 : i64} {
  func.func @_sq_diff_kernel(%arg0: i32, %arg1: memref<4x512xf32, #tpu.memory_space<vmem>>, %arg2: memref<4x512xf32, #tpu.memory_space<vmem>>, %arg3: memref<4x512xf32, #tpu.memory_space<vmem>>) attributes {dimension_semantics = [#tpu.dimension_semantics<parallel>], iteration_bounds = array<i64: 1>, scalar_prefetch = 0 : i64, scratch_operands = 0 : i64, tpu.core_type = #tpu.core_type<tc>, window_params = [{transform_indices = @transform_0, window_bounds = array<i64: 4, 512>}, {transform_indices = @transform_1, window_bounds = array<i64: 4, 512>}, {transform_indices = @transform_2, window_bounds = array<i64: 4, 512>}]} {
    %c0 = arith.constant 0 : index
    %c0_0 = arith.constant 0 : index
    %0 = vector.load %arg1[%c0, %c0_0] : memref<4x512xf32, #tpu.memory_space<vmem>>, vector<4x512xf32>
    %c0_1 = arith.constant 0 : index
    %c0_2 = arith.constant 0 : index
    %1 = vector.load %arg2[%c0_1, %c0_2] : memref<4x512xf32, #tpu.memory_space<vmem>>, vector<4x512xf32>
    %2 = arith.subf %0, %1 : vector<4x512xf32>
    %3 = arith.mulf %2, %2 : vector<4x512xf32>
    %c0_3 = arith.constant 0 : index
    %c0_4 = arith.constant 0 : index
    %4 = vector.load %arg3[%c0_3, %c0_4] : memref<4x512xf32, #tpu.memory_space<vmem>>, vector<4x512xf32>
    tpu.vector_store %arg3[%c0_3, %c0_4], %3 {strides = array<i32>} : memref<4x512xf32, #tpu.memory_space<vmem>>, vector<4x512xf32>,
    return
  }
  func.func @transform_0(%arg0: i32) -> (i32, i32) {
    %c0_i32 = arith.constant 0 : i32
    %c0_i32_0 = arith.constant 0 : i32
    return %arg0, %c0_i32 : i32, i32
  }
  func.func @transform_1(%arg0: i32) -> (i32, i32) {
    %c0_i32 = arith.constant 0 : i32
    %c0_i32_0 = arith.constant 0 : i32
    return %arg0, %c0_i32 : i32, i32
  }
  func.func @transform_2(%arg0: i32) -> (i32, i32) {
    %c0_i32 = arith.constant 0 : i32
    %c0_i32_0 = arith.constant 0 : i32
    return %arg0, %c0_i32 : i32, i32
  }
}

</mosaic_0001>

<bundles_post_ra>
// kernel: tpu_custom_call.1
= control target key start
LH: loop header
LB: loop body
LE: loop exit
PB: predicated region body
PF: predicated region fallthrough
CT: control target
= control target key end

     0   :  { %7 = vsyncpa [#allocation3], 0  ;;  %s191_s0 = inlined_call_operand.hbm [shape: f32[4,512], index: 0, kind: input, shape index: {}]   ;;  %s192_s1 = inlined_call_operand.hbm [shape: f32[4,512], index: 1, kind: input, shape index: {}]   ;;  %s193_s2 = inlined_call_operand.hbm [shape: f32[4,512], index: 2, kind: output, shape index: {}]  }
   0x1   :  { %8 = vsyncpa [#allocation6], 0 }
   0x2   :  { %9 = vsyncpa [#allocation4], 0  ;;  %s137_s9 = smov [#allocation2]   ;;  %s138_s11 = smov [#allocation5]  }
   0x3   :  { %s16_s10 = sshll.u32 %s137_s9, 4  ;;  %s26_s12 = sshll.u32 %s138_s11, 4  ;;  %s17_s10 = int_to_ptr.vmem [resolvable:$true] %s16_s10  ;;  %s27_s12 = int_to_ptr.vmem [resolvable:$true] %s26_s12 }
   0x4   :  { %s65_s15 = scalar_lea.hbm %s191_s0, 256 }
   0x5   :  { %p66_p0 = scmp.ne.s32.totalorder %s191_s0, %s65_s15  ;;  %p69_p1 = scmp.lt.u32.totalorder %s65_s15, %s191_s0 }
   0x7   :  { %p71_p2 = pnand %p69_p1, %p66_p0 }
   0x9   :  { %74 = shalt.err (!%p71_p2)
}
   0xa   :  { %s75_s20 = scalar_lea.vmem %s17_s10, 256  ;;  %p80_p4 = scmp.lt.s32.totalorder %s17_s10, %s17_s10 }
   0xb   :  { %p76_p3 = scmp.ne.s32.totalorder %s17_s10, %s75_s20  ;;  %p81_p5 = scmp.lt.s32.totalorder %s75_s20, %s75_s20 }
   0xd   :  { %p82_p6 = por %p81_p5, %p80_p4 }
   0xf   :  { %p83_p7 = pnand %p82_p6, %p76_p3 }
  0x11   :  { %86 = shalt.err (!%p83_p7)
}
  0x12   :  { %19 = dma.hbm_to_vmem [thread:$0]  %s191_s0, 256, %s17_s10, [#allocation3]  }
  0x13   :  { %s87_s25 = scalar_lea.hbm %s192_s1, 256 }
  0x14   :  { %p88_p8 = scmp.ne.s32.totalorder %s192_s1, %s87_s25  ;;  %p91_p9 = scmp.lt.u32.totalorder %s87_s25, %s192_s1 }
  0x16   :  { %p93_p10 = pnand %p91_p9, %p88_p8 }
  0x18   :  { %96 = shalt.err (!%p93_p10)
}
  0x19   :  { %s97_s30 = scalar_lea.vmem %s27_s12, 256  ;;  %p102_p12 = scmp.lt.s32.totalorder %s27_s12, %s27_s12 }
  0x1a   :  { %p98_p11 = scmp.ne.s32.totalorder %s27_s12, %s97_s30  ;;  %p103_p13 = scmp.lt.s32.totalorder %s97_s30, %s97_s30 }
  0x1c   :  { %p104_p0 = por %p103_p13, %p102_p12 }
  0x1e   :  { %p105_p1 = pnand %p104_p0, %p98_p11 }
  0x20   :  { %108 = shalt.err (!%p105_p1)
}
  0x21   :  { %29 = dma.hbm_to_vmem [thread:$0]  %s192_s1, 256, %s27_s12, [#allocation6]  }
  0x22   :  { %131 = dma.done.wait [#allocation3], 256  }
  0x23   :  { %132 = vsyncadd [#allocation3], 4294967040 }
  0x24   :  { %133 = dma.done.wait [#allocation6], 256  }
  0x25   :  { %134 = vsyncadd [#allocation6], 4294967040  ;;  %v36_v0 = vld [vmem:[#allocation2] sm:$0xff]  ;;  %v38_v1 = vld [vmem:[#allocation5] sm:$0xff]  ;;  %s139_s4 = smov [#allocation7]  }
  0x26   :  { %v37_v2 = vld [vmem:[#allocation2 + $0x8] sm:$0xff]  ;;  %v40_v3 = vsub.f32 %v36_v0, %v38_v1  ;;  %v39_v4 = vld [vmem:[#allocation5 + $0x8] sm:$0xff]  ;;  %s52_s5 = sshll.u32 %s139_s4, 4  ;;  %s53_s5 = int_to_ptr.vmem [resolvable:$true] %s52_s5 }
  0x27   :  { %v41_v5 = vsub.f32 %v37_v2, %v39_v4  ;;  %s109_s6 = scalar_lea.vmem %s53_s5, 256  ;;  %p114_p3 = scmp.lt.s32.totalorder %s53_s5, %s53_s5 }
  0x28   :  { %v42_v6 = vmul.f32 %v40_v3, %v40_v3  ;;  %p110_p2 = scmp.ne.s32.totalorder %s53_s5, %s109_s6  ;;  %p115_p4 = scmp.lt.s32.totalorder %s109_s6, %s109_s6 }
  0x29   :  { %v43_v7 = vmul.f32 %v41_v5, %v41_v5 }
  0x2a   :  { %44 = vst [vmem:[#allocation7] sm:$0xff] %v42_v6  ;;  %p116_p5 = por %p115_p4, %p114_p3 }
  0x2b   :  { %45 = vst [vmem:[#allocation7 + $0x8] sm:$0xff] %v43_v7 }
  0x2c   :  { %p117_p6 = pnand %p116_p5, %p110_p2 }
  0x2e   :  { %120 = shalt.err (!%p117_p6)
}
  0x2f   :  { %s121_s8 = scalar_lea.hbm %s193_s2, 256 }
  0x30   :  { %p122_p7 = scmp.ne.s32.totalorder %s193_s2, %s121_s8  ;;  %p125_p8 = scmp.lt.u32.totalorder %s121_s8, %s193_s2 }
  0x32   :  { %p127_p9 = pnand %p125_p8, %p122_p7 }
  0x34   :  { %130 = shalt.err (!%p127_p9)
}
  0x35   :  { %55 = dma.vmem_to_hbm [thread:$0]  %s53_s5, 256, %s193_s2, [#allocation4]  }
  0x36   :  { %135 = dma.done.wait [#allocation4], 256  }
  0x37   :  { %136 = vsyncadd [#allocation4], 4294967040 }
  0x38   :  { %59 = vsyncpa [#allocation3], 1 }
  0x39   :  { %60 = vsyncpa [#allocation6], 1 }
  0x3a   :  { %61 = vsyncpa [#allocation4], 1 }

</bundles_post_ra>
